<compile_context>
chip_gen: v5e
topology: v5e:2x2
jax: 0.10.0
libtpu: 0.0.40
codegen_flags: <defaults>
</compile_context>

<pallas_src>
import numpy as np
import jax
import jax.numpy as jnp
from jax.experimental import pallas as pl
from jax.experimental.pallas import tpu as pltpu  # noqa: F401  (TPU backend)

C0, C1, C2 = 5, 6, 3            # torch.split sizes along the channel dim
C_IN = C0 + C1 + C2             # 14 input channels
C_OUT = C1 + C0 + C2 + C1       # 20 channels after concat
V1 = np.array([0.0625, 0.125, 0.25, 0.375, 0.5, 0.625], dtype=np.float32)
W = V1.shape[0]                 # v1 broadcasts over the last (W) dim -> W == 6


def split_scale_concat_kernel(x_ref, v_ref, o_ref):
    """x_ref: (C_IN, H*W); v_ref: (1, H*W) tiled v1; o_ref: (C_OUT, H*W)."""
    v = v_ref[...]                        # (1, HW) row, broadcasts over sublanes
    v2 = v * v                            # prefold v1^2 once (single tiny row)
    s0 = x_ref[0:C0, :]                   # (5, HW)
    s1 = x_ref[C0:C0 + C1, :]             # (6, HW)
    s2 = x_ref[C0 + C1:C_IN, :]           # (3, HW)
    vs1 = v * s1                          # computed once, stored twice
    o_ref[0:C1, :] = vs1                  # cat segment 0: v1 * s1
    o_ref[C1:C1 + C0, :] = v2 * s0        # cat segment 1: v1 * (v1 * s0)
    o_ref[C1 + C0:C1 + C0 + C2, :] = v * s2   # cat segment 2: v1 * s2
    o_ref[C1 + C0 + C2:C_OUT, :] = vs1    # cat segment 3: v1 * s1 (duplicate)


def model_forward(x1):
    """Mirrors Model.forward; returns (True, concatenated_tensor)."""
    N, C, H, Wd = x1.shape
    assert N == 1, "module trace uses batch size 1"
    assert C == C_IN, f"channel dim must be {C_IN} (= 5 + 6 + 3) to split"
    assert Wd == W, "v1 (6 elements) must broadcast over the last dim"
    hw = H * Wd

    # Lane-dense re-layout: channels on the sublane axis, flattened H*W on the
    # lane axis.  v1 is pre-tiled along H so it lines up with the flattening.
    x2d = x1.astype(jnp.float32).reshape(C_IN, hw)
    v_row = jnp.asarray(np.tile(V1, H).reshape(1, hw))

    out2d = pl.pallas_call(
        split_scale_concat_kernel,
        out_shape=jax.ShapeDtypeStruct((C_OUT, hw), jnp.float32),
        in_specs=[
            pl.BlockSpec((C_IN, hw), lambda: (0, 0)),   # full-extent block
            pl.BlockSpec((1, hw), lambda: (0, 0)),
        ],
        out_specs=pl.BlockSpec((C_OUT, hw), lambda: (0, 0)),
    )(x2d, v_row)

    concatenated = out2d.reshape(1, C_OUT, H, Wd)
    return True, concatenated


if __name__ == "__main__":
    key = jax.random.PRNGKey(0)
    # Shape consistent with the module's ops: N=1, C=14 (=5+6+3), H=23, W=6.
    x1 = jax.random.normal(key, (1, C_IN, 23, W), dtype=jnp.float32)

    result, cat = model_forward(x1)
    cat = jax.block_until_ready(cat)

    # Pure-JAX reference for correctness.
    v1 = jnp.asarray(V1)
    s0, s1, s2 = x1[:, 0:C0], x1[:, C0:C0 + C1], x1[:, C0 + C1:C_IN]
    ref = v1 * jnp.concatenate([s1, v1 * s0, s2, s1], axis=1)

    assert result is True
    assert cat.shape == (1, C_OUT, 23, W)
    assert jnp.allclose(cat, ref, atol=1e-6, rtol=1e-6)

    print("KERNEL_OK")
</pallas_src>

<mosaic_0001>
module attributes {stable_mosaic.version = 11 : i64} {
  func.func @split_scale_concat_kernel(%arg0: memref<14x138xf32, #tpu.memory_space<vmem>>, %arg1: memref<1x138xf32, #tpu.memory_space<vmem>>, %arg2: memref<20x138xf32, #tpu.memory_space<vmem>>) attributes {dimension_semantics = [], scalar_prefetch = 0 : i64, scratch_operands = 0 : i64, tpu.core_type = #tpu.core_type<tc>} {
    %c0 = arith.constant 0 : index
    %c0_0 = arith.constant 0 : index
    %0 = vector.load %arg1[%c0, %c0_0] : memref<1x138xf32, #tpu.memory_space<vmem>>, vector<1x138xf32>
    %1 = arith.mulf %0, %0 : vector<1x138xf32>
    %c0_1 = arith.constant 0 : index
    %c0_2 = arith.constant 0 : index
    %2 = vector.load %arg0[%c0_1, %c0_2] : memref<14x138xf32, #tpu.memory_space<vmem>>, vector<5x138xf32>
    %c5 = arith.constant 5 : index
    %c0_3 = arith.constant 0 : index
    %3 = vector.load %arg0[%c5, %c0_3] : memref<14x138xf32, #tpu.memory_space<vmem>>, vector<6x138xf32>
    %c11 = arith.constant 11 : index
    %c0_4 = arith.constant 0 : index
    %4 = vector.load %arg0[%c11, %c0_4] : memref<14x138xf32, #tpu.memory_space<vmem>>, vector<3x138xf32>
    %5 = vector.broadcast %0 : vector<1x138xf32> to vector<6x138xf32>
    %6 = arith.mulf %5, %3 : vector<6x138xf32>
    %c0_5 = arith.constant 0 : index
    %c0_6 = arith.constant 0 : index
    %7 = vector.load %arg2[%c0_5, %c0_6] : memref<20x138xf32, #tpu.memory_space<vmem>>, vector<6x138xf32>
    tpu.vector_store %arg2[%c0_5, %c0_6], %6 {strides = array<i32>} : memref<20x138xf32, #tpu.memory_space<vmem>>, vector<6x138xf32>,
    %8 = vector.broadcast %1 : vector<1x138xf32> to vector<5x138xf32>
    %9 = arith.mulf %8, %2 : vector<5x138xf32>
    %c6 = arith.constant 6 : index
    %c0_7 = arith.constant 0 : index
    %10 = vector.load %arg2[%c6, %c0_7] : memref<20x138xf32, #tpu.memory_space<vmem>>, vector<5x138xf32>
    tpu.vector_store %arg2[%c6, %c0_7], %9 {strides = array<i32>} : memref<20x138xf32, #tpu.memory_space<vmem>>, vector<5x138xf32>,
    %11 = vector.broadcast %0 : vector<1x138xf32> to vector<3x138xf32>
    %12 = arith.mulf %11, %4 : vector<3x138xf32>
    %c11_8 = arith.constant 11 : index
    %c0_9 = arith.constant 0 : index
    %13 = vector.load %arg2[%c11_8, %c0_9] : memref<20x138xf32, #tpu.memory_space<vmem>>, vector<3x138xf32>
    tpu.vector_store %arg2[%c11_8, %c0_9], %12 {strides = array<i32>} : memref<20x138xf32, #tpu.memory_space<vmem>>, vector<3x138xf32>,
    %c14 = arith.constant 14 : index
    %c0_10 = arith.constant 0 : index
    %14 = vector.load %arg2[%c14, %c0_10] : memref<20x138xf32, #tpu.memory_space<vmem>>, vector<6x138xf32>
    tpu.vector_store %arg2[%c14, %c0_10], %6 {strides = array<i32>} : memref<20x138xf32, #tpu.memory_space<vmem>>, vector<6x138xf32>,
    return
  }
}

</mosaic_0001>

<bundles_post_ra>
// kernel: tpu_custom_call.1
= control target key start
LH: loop header
LB: loop body
LE: loop exit
PB: predicated region body
PF: predicated region fallthrough
CT: control target
= control target key end

     0   :  { %7 = vsyncpa [#allocation3], 0  ;;  %s260_s0 = inlined_call_operand.hbm [shape: f32[14,138], index: 0, kind: input, shape index: {}]   ;;  %s261_s1 = inlined_call_operand.hbm [shape: f32[1,138], index: 1, kind: input, shape index: {}]   ;;  %s262_s2 = inlined_call_operand.hbm [shape: f32[20,138], index: 2, kind: output, shape index: {}]  }
   0x1   :  { %8 = vsyncpa [#allocation6], 0 }
   0x2   :  { %9 = vsyncpa [#allocation4], 0  ;;  %s14_s11 = sshll.u32 %s260_s0, 4  ;;  %s220_s12 = smov [#allocation2]   ;;  %s15_s11 = int_to_ptr.hbm [resolvable:$true] %s14_s11 }
   0x3   :  { %s16_s13 = sshll.u32 %s220_s12, 4  ;;  %s28_s16 = sshll.u32 %s261_s1, 4  ;;  %s17_s13 = int_to_ptr.vmem [resolvable:$true] %s16_s13  ;;  %s29_s16 = int_to_ptr.hbm [resolvable:$true] %s28_s16 }
   0x4   :  { %s221_s17 = smov 256   ;;  %s222_s18 = smov 16  }
   0x5   :  { %22 = dma.hbm_to_vmem [thread:$0]  %s15_s11, 512, %s17_s13, [#allocation3], %s221_s17, %s221_s17, %s222_s18  }
   0x6   :  { %s223_s19 = smov [#allocation5]  }
   0x7   :  { %s30_s20 = sshll.u32 %s223_s19, 4  ;;  %s31_s20 = int_to_ptr.vmem [resolvable:$true] %s30_s20 }
   0x8   :  { %33 = dma.hbm_to_vmem [thread:$0]  %s29_s16, 32, %s31_s20, [#allocation6]  }
   0x9   :  { %214 = dma.done.wait [#allocation3], 512  }
   0xa   :  { %215 = vsyncadd [#allocation3], 4294966784 }
   0xb   :  { %216 = dma.done.wait [#allocation6], 32  }
   0xc   :  { %217 = vsyncadd [#allocation6], 4294967264  ;;  %v42_v0 = vld [vmem:[#allocation5] sm:$0x3]  ;;  %v46_v1 = vld [vmem:[#allocation2] sm:$0xe0] }
   0xd   :  { %v48_v2 = vld [vmem:[#allocation2 + $0x10] sm:$0x7]  ;;  %v53_v3 = vperm.slane %v42_v0, 0  ;;  %v47_v4 = vld [vmem:[#allocation2 + $0x8] sm:$0xe0]  ;;  %v54_v6 = vperm.slane %v42_v0, 1  ;;  %v43_v7 = vmul.f32 %v42_v0, %v42_v0 }
   0xe   :  { %v49_v5 = vld [vmem:[#allocation2 + $0x18] sm:$0x7]  ;;  %vm65_vm0 = vcmask 1042432   ;;  %v50_v8 = vld [vmem:[#allocation2 + $0x10] sm:$0x38]  ;;  %vm99_vm1 = vcmask 78851  }
   0xf   :  { %v57_v9 = vmul.f32 %v53_v3, %v46_v1  ;;  %v59_v10 = vmul.f32 %v53_v3, %v48_v2  ;;  %v58_v11 = vmul.f32 %v54_v6, %v47_v4  ;;  %v60_v12 = vmul.f32 %v54_v6, %v49_v5  ;;  %v44_v13 = vld [vmem:[#allocation2] sm:$0x1f]  ;;  %v45_v14 = vld [vmem:[#allocation2 + $0x8] sm:$0x1f]  ;;  %v51_v15 = vld [vmem:[#allocation2 + $0x18] sm:$0x38] }
  0x10   :  { %v78_v16 = vperm.slane %v43_v7, 0  ;;  %v79_v17 = vperm.slane %v43_v7, 1  ;;  %v96_v18 = vmul.f32 %v53_v3, %v50_v8  ;;  %v97_v19 = vmul.f32 %v54_v6, %v51_v15  ;;  %s224_s0 = smov [#allocation7]   ;;  %s123_s23 = sshll.u32 %s262_s2, 4  ;;  %s124_s23 = int_to_ptr.hbm [resolvable:$true] %s123_s23 }
  0x11   :  { %v66_v20 = vrot.slane %v57_v9, 5  ;;  %v67_v21 = vrot.slane %v59_v10, 5  ;;  %v69_v22 = vrot.slane %v58_v11, 5  ;;  %v70_v23 = vrot.slane %v60_v12, 5  ;;  %s121_s1 = sshll.u32 %s224_s0, 4  ;;  %s122_s1 = int_to_ptr.vmem [resolvable:$true] %s121_s1 }
  0x12   :  { %vm75_vm2 = vcmask 78848   ;;  %v82_v24 = vmul.f32 %v78_v16, %v44_v13  ;;  %v83_v25 = vmul.f32 %v79_v17, %v45_v14  ;;  %98 = vst [vmem:[#allocation7 + $0x10] sm:$0x38] %v96_v18  ;;  %vm91_vm3 = vcmask 80902  }
  0x13   :  { %v68_v26 = vsel %vm65_vm0, %v66_v20, %v67_v21  ;;  %v71_v27 = vsel %vm65_vm0, %v69_v22, %v70_v23  ;;  %100 = vst.msk [vmem:[#allocation7 + $0x18] sm:$0x38] %vm99_vm1, %v97_v19  ;;  %v102_v30 = vrot.slane %v57_v9, 7  ;;  %v104_v31 = vrot.slane %v59_v10, 7 }
  0x14   :  { %74 = vst [vmem:[#allocation7] sm:$0x3f] %v68_v26  ;;  %v86_v28 = vrot.slane %v82_v24, 2  ;;  %v87_v29 = vrot.slane %v83_v25, 2  ;;  %vm94_vm4 = vcmask 75776   ;;  %v103_v32 = vrot.slane %v58_v11, 7 }
  0x15   :  { %76 = vst.msk [vmem:[#allocation7 + $0x8] sm:$0x3f] %vm75_vm2, %v71_v27  ;;  %vm101_vm5 = vcmask 1040384   ;;  %v106_v33 = vrot.slane %v60_v12, 7  ;;  %vm115_vm6 = vcmask 76800  }
  0x16   :  { %90 = vst [vmem:[#allocation7] sm:$0xc0] %v86_v28  ;;  %v105_v34 = vsel %vm101_vm5, %v102_v30, %v104_v31 }
  0x17   :  { %93 = vst [vmem:[#allocation7 + $0x10] sm:$0x7] %v86_v28  ;;  %v107_v35 = vsel %vm101_vm5, %v103_v32, %v106_v33 }
  0x18   :  { %92 = vst.msk [vmem:[#allocation7 + $0x8] sm:$0xc0] %vm91_vm3, %v87_v29 }
  0x19   :  { %95 = vst.msk [vmem:[#allocation7 + $0x18] sm:$0x7] %vm94_vm4, %v87_v29 }
  0x1a   :  { %112 = vst [vmem:[#allocation7 + $0x10] sm:$0xc0] %v102_v30 }
  0x1b   :  { %113 = vst.msk [vmem:[#allocation7 + $0x18] sm:$0xc0] %vm91_vm3, %v103_v32 }
  0x1c   :  { %114 = vst [vmem:[#allocation7 + $0x20] sm:$0xf] %v105_v34 }
  0x1d   :  { %116 = vst.msk [vmem:[#allocation7 + $0x28] sm:$0xf] %vm115_vm6, %v107_v35 }
  0x1e   :  { %129 = dma.vmem_to_hbm [thread:$0]  %s122_s1, 768, %s124_s23, [#allocation4], %s221_s17, %s221_s17, %s222_s18  }
  0x1f   :  { %218 = dma.done.wait [#allocation4], 768  }
  0x20   :  { %219 = vsyncadd [#allocation4], 4294966528 }
  0x21   :  { %134 = vsyncpa [#allocation3], 1 }
  0x22   :  { %135 = vsyncpa [#allocation6], 1 }
  0x23   :  { %136 = vsyncpa [#allocation4], 1 }

</bundles_post_ra>
